<compile_context>
chip_gen: v5e
topology: v5e:2x2
jax: 0.10.0
libtpu: 0.0.40
codegen_flags: <defaults>
</compile_context>

<pallas_src>
import functools

import jax
import jax.numpy as jnp
from jax.experimental import pallas as pl
from jax.experimental.pallas import tpu as pltpu


def _round_up(x, m):
    return (x + m - 1) // m * m


def linear_kernel(x_ref, w_ref, b_ref, o_ref):
    """One (tm, tn) output tile; full K contraction in a single MXU call."""
    o_ref[...] = (
        jnp.dot(x_ref[...], w_ref[...], preferred_element_type=jnp.float32)
        + b_ref[...]
    ).astype(o_ref.dtype)


@functools.partial(jax.jit, static_argnames=("tn_max",))
def linear_pallas(x, w_t, b, *, tn_max=512):
    """x: [M, K], w_t: [K, N] (pre-transposed, N % 128 == 0), b: [1, N].

    Returns [M, N].  Pads the batch axis up to a multiple of 8 internally.
    """
    M, K = x.shape
    K2, N = w_t.shape
    assert K == K2, (K, K2)
    assert N % 128 == 0, "pad N (num_classes) to a multiple of 128 at init"
    assert b.shape == (1, N)

    # --- N tile: as wide as possible (lane-dense stores, big weight slabs) ---
    tn = 128
    for cand in (tn_max, 256, 128):
        if cand <= tn_max and N % cand == 0:
            tn = cand
            break

    # --- M tile: batch is small; just round up to the sublane granule ---
    tm = min(256, _round_up(M, 8))
    M_pad = _round_up(M, tm)
    if M_pad != M:
        x = jnp.pad(x, ((0, M_pad - M), (0, 0)))

    grid = (M_pad // tm, N // tn)

    cost = pl.CostEstimate(
        flops=2 * M_pad * K * N,
        transcendentals=0,
        bytes_accessed=4 * (M_pad * K + K * N + M_pad * N),
    )

    out = pl.pallas_call(
        linear_kernel,
        out_shape=jax.ShapeDtypeStruct((M_pad, N), x.dtype),
        grid_spec=pltpu.PrefetchScalarGridSpec(
            num_scalar_prefetch=0,
            grid=grid,
            in_specs=[
                pl.BlockSpec((tm, K), lambda i, j: (i, 0)),   # x row-slab (full K)
                pl.BlockSpec((K, tn), lambda i, j: (0, j)),   # weight column-slab
                pl.BlockSpec((1, tn), lambda i, j: (0, j)),   # bias tile
            ],
            out_specs=pl.BlockSpec((tm, tn), lambda i, j: (i, j)),
        ),
        compiler_params=pltpu.CompilerParams(
            # both axes independent -> megacore / 2-TC sharding on v7x
            dimension_semantics=("parallel", "parallel"),
        ),
        cost_estimate=cost,
    )(x, w_t, b)

    if M_pad != M:
        out = out[:M]
    return out


class ModifiedResnet50PartB:
    """JAX/Pallas equivalent of Modified_resnet50_Part_B (the fc head only)."""

    def __init__(self, in_features, num_classes, key):
        kw, kb = jax.random.split(key)
        bound = 1.0 / jnp.sqrt(jnp.float32(in_features))
        # PyTorch layout: weight [num_classes, in_features], bias [num_classes]
        self.weight = jax.random.uniform(
            kw, (num_classes, in_features), jnp.float32, -bound, bound
        )
        self.bias = jax.random.uniform(
            kb, (num_classes,), jnp.float32, -bound, bound
        )
        self.num_classes = num_classes

        # Hoist the transpose + padding out of the per-call hot path.
        n_pad = _round_up(num_classes, 128)
        w_t = self.weight.T                                   # [K, N]
        self.w_t_pad = jnp.pad(w_t, ((0, 0), (0, n_pad - num_classes)))
        self.b_pad = jnp.pad(
            self.bias.reshape(1, -1), ((0, 0), (0, n_pad - num_classes))
        )

    def __call__(self, x):
        out = linear_pallas(x, self.w_t_pad, self.b_pad)      # [M, N_pad]
        return out[:, : self.num_classes]


if __name__ == "__main__":
    key = jax.random.PRNGKey(0)
    k_x, k_params = jax.random.split(key)

    # Small synthetic shapes consistent with the module
    # (real resnet50 head would be in_features=2048, num_classes=1000;
    #  num_classes=100 exercises the non-multiple-of-128 padding path).
    batch = 8
    in_features = 256
    num_classes = 100

    x = jax.random.normal(k_x, (batch, in_features), jnp.float32)

    model = ModifiedResnet50PartB(in_features, num_classes, k_params)
    out = model(x)
    out = jax.block_until_ready(out)

    # correctness check vs plain JAX reference
    ref = x @ model.weight.T + model.bias
    assert out.shape == (batch, num_classes), out.shape
    assert jnp.allclose(out, ref, atol=1e-4, rtol=1e-4)

    print("KERNEL_OK")
</pallas_src>

<mosaic_0001>
module attributes {stable_mosaic.version = 11 : i64} {
  func.func @linear_kernel(%arg0: i32, %arg1: i32, %arg2: memref<8x256xf32, #tpu.memory_space<vmem>>, %arg3: memref<256x128xf32, #tpu.memory_space<vmem>>, %arg4: memref<1x128xf32, #tpu.memory_space<vmem>>, %arg5: memref<8x128xf32, #tpu.memory_space<vmem>>) attributes {dimension_semantics = [#tpu.dimension_semantics<parallel>, #tpu.dimension_semantics<parallel>], iteration_bounds = array<i64: 1, 1>, scalar_prefetch = 0 : i64, scratch_operands = 0 : i64, tpu.core_type = #tpu.core_type<tc>, window_params = [{transform_indices = @transform_0, window_bounds = array<i64: 8, 256>}, {transform_indices = @transform_1, window_bounds = array<i64: 256, 128>}, {transform_indices = @transform_2, window_bounds = array<i64: 1, 128>}, {transform_indices = @transform_3, window_bounds = array<i64: 8, 128>}]} {
    %c0 = arith.constant 0 : index
    %c0_0 = arith.constant 0 : index
    %0 = vector.load %arg2[%c0, %c0_0] : memref<8x256xf32, #tpu.memory_space<vmem>>, vector<8x256xf32>
    %c0_1 = arith.constant 0 : index
    %c0_2 = arith.constant 0 : index
    %1 = vector.load %arg3[%c0_1, %c0_2] : memref<256x128xf32, #tpu.memory_space<vmem>>, vector<256x128xf32>
    %cst = arith.constant dense<0.000000e+00> : vector<8x128xf32>
    %2 = tpu.matmul %0, %1, %cst {dimension_numbers = #tpu.dot_dimension_numbers<[1], [0], [0], [1], [0, 0, 1, 1], [], []>} : vector<8x256xf32>, vector<256x128xf32>, vector<8x128xf32> -> vector<8x128xf32>
    %c0_3 = arith.constant 0 : index
    %c0_4 = arith.constant 0 : index
    %3 = vector.load %arg4[%c0_3, %c0_4] : memref<1x128xf32, #tpu.memory_space<vmem>>, vector<1x128xf32>
    %4 = vector.broadcast %3 : vector<1x128xf32> to vector<8x128xf32>
    %5 = arith.addf %2, %4 : vector<8x128xf32>
    %c0_5 = arith.constant 0 : index
    %c0_6 = arith.constant 0 : index
    %6 = vector.load %arg5[%c0_5, %c0_6] : memref<8x128xf32, #tpu.memory_space<vmem>>, vector<8x128xf32>
    tpu.vector_store %arg5[%c0_5, %c0_6], %5 {strides = array<i32>} : memref<8x128xf32, #tpu.memory_space<vmem>>, vector<8x128xf32>,
    return
  }
  func.func @transform_0(%arg0: i32, %arg1: i32) -> (i32, i32) {
    %c0_i32 = arith.constant 0 : i32
    %c0_i32_0 = arith.constant 0 : i32
    return %arg0, %c0_i32 : i32, i32
  }
  func.func @transform_1(%arg0: i32, %arg1: i32) -> (i32, i32) {
    %c0_i32 = arith.constant 0 : i32
    %c0_i32_0 = arith.constant 0 : i32
    return %c0_i32, %arg1 : i32, i32
  }
  func.func @transform_2(%arg0: i32, %arg1: i32) -> (i32, i32) {
    %c0_i32 = arith.constant 0 : i32
    %c0_i32_0 = arith.constant 0 : i32
    return %c0_i32, %arg1 : i32, i32
  }
  func.func @transform_3(%arg0: i32, %arg1: i32) -> (i32, i32) {
    %c0_i32 = arith.constant 0 : i32
    return %arg0, %arg1 : i32, i32
  }
}

</mosaic_0001>

<bundles_post_ra>
// kernel: linear_pallas.1
= control target key start
LH: loop header
LB: loop body
LE: loop exit
PB: predicated region body
PF: predicated region fallthrough
CT: control target
= control target key end

     0   :  { %8 = vsyncpa [#allocation3], 0  ;;  %s263_s0 = inlined_call_operand.hbm [shape: f32[8,256], index: 0, kind: input, shape index: {}]   ;;  %s264_s1 = inlined_call_operand.hbm [shape: f32[256,128], index: 1, kind: input, shape index: {}]   ;;  %s265_s2 = inlined_call_operand.vmem [shape: f32[1,128], index: 2, kind: input, shape index: {}]   ;;  %s266_s3 = inlined_call_operand.hbm [shape: f32[8,128], index: 3, kind: output, shape index: {}]  }
   0x1   :  { %9 = vsyncpa [#allocation6], 0 }
   0x2   :  { %10 = vsyncpa [#allocation4], 0  ;;  %s16_s14 = sshll.u32 %s263_s0, 4  ;;  %s226_s15 = smov [#allocation2]   ;;  %s17_s14 = int_to_ptr.hbm [resolvable:$true] %s16_s14 }
   0x3   :  { %s18_s16 = sshll.u32 %s226_s15, 4  ;;  %s26_s19 = sshll.u32 %s264_s1, 4  ;;  %s19_s16 = int_to_ptr.vmem [resolvable:$true] %s18_s16  ;;  %s27_s19 = int_to_ptr.hbm [resolvable:$true] %s26_s19 }
   0x4   :  { %21 = dma.hbm_to_vmem [thread:$0]  %s17_s14, 256, %s19_s16, [#allocation3]  }
   0x5   :  { %s227_s20 = smov [#allocation5]   ;;  %s228_s22 = smov 128  }
   0x6   :  { %s28_s21 = sshll.u32 %s227_s20, 4  ;;  %s229_s23 = smov 8   ;;  %s29_s21 = int_to_ptr.vmem [resolvable:$true] %s28_s21 }
   0x7   :  { %34 = dma.hbm_to_vmem [thread:$0]  %s27_s19, 4096, %s29_s21, [#allocation6], %s228_s22, %s228_s22, %s229_s23  }
   0x8   :  { %220 = dma.done.wait [#allocation3], 256  }
   0x9   :  { %221 = vsyncadd [#allocation3], 4294967040 }
   0xa   :  { %222 = dma.done.wait [#allocation6], 4096  }
   0xb   :  { %223 = vsyncadd [#allocation6], 4294963200  ;;  %v62_v0 = vld [vmem:[#allocation5 + $0x78] sm:$0xff]  ;;  %v61_v1 = vld [vmem:[#allocation5 + $0x70] sm:$0xff]  ;;  %s230_s24 = smov [#allocation7]   ;;  %s131_s28 = sshll.u32 %s266_s3, 4  ;;  %s132_s28 = int_to_ptr.hbm [resolvable:$true] %s131_s28 }
   0xc   :  { %v78_v2 = vld [vmem:[#allocation5 + $0xf8] sm:$0xff]  ;;  %83 = vmatpush.msra.mxu0 %v62_v0  ;;  %v77_v3 = vld [vmem:[#allocation5 + $0xf0] sm:$0xff]  ;;  %v60_v4 = vld [vmem:[#allocation5 + $0x68] sm:$0xff]  ;;  %s129_s25 = sshll.u32 %s230_s24, 4  ;;  %s130_s25 = int_to_ptr.vmem [resolvable:$true] %s129_s25 }
   0xd   :  { %103 = vmatpush.msra.mxu1 %v78_v2  ;;  %v76_v5 = vld [vmem:[#allocation5 + $0xe8] sm:$0xff]  ;;  %v59_v6 = vld [vmem:[#allocation5 + $0x60] sm:$0xff]  ;;  %v58_v8 = vld [vmem:[#allocation5 + $0x58] sm:$0xff] }
   0xe   :  { %84 = vmatpush.msra.mxu0 %v61_v1  ;;  %v75_v7 = vld [vmem:[#allocation5 + $0xe0] sm:$0xff]  ;;  %v74_v9 = vld [vmem:[#allocation5 + $0xd8] sm:$0xff]  ;;  %v57_v10 = vld [vmem:[#allocation5 + $0x50] sm:$0xff] }
   0xf   :  { %104 = vmatpush.msra.mxu1 %v77_v3  ;;  %v73_v11 = vld [vmem:[#allocation5 + $0xd0] sm:$0xff]  ;;  %v56_v12 = vld [vmem:[#allocation5 + $0x48] sm:$0xff]  ;;  %v55_v14 = vld [vmem:[#allocation5 + $0x40] sm:$0xff] }
  0x10   :  { %85 = vmatpush.msra.mxu0 %v60_v4  ;;  %v72_v13 = vld [vmem:[#allocation5 + $0xc8] sm:$0xff]  ;;  %v71_v15 = vld [vmem:[#allocation5 + $0xc0] sm:$0xff]  ;;  %v54_v16 = vld [vmem:[#allocation5 + $0x38] sm:$0xff] }
  0x11   :  { %105 = vmatpush.msra.mxu1 %v76_v5  ;;  %v70_v17 = vld [vmem:[#allocation5 + $0xb8] sm:$0xff]  ;;  %v53_v18 = vld [vmem:[#allocation5 + $0x30] sm:$0xff]  ;;  %v52_v20 = vld [vmem:[#allocation5 + $0x28] sm:$0xff] }
  0x12   :  { %86 = vmatpush.msra.mxu0 %v59_v6  ;;  %v69_v19 = vld [vmem:[#allocation5 + $0xb0] sm:$0xff]  ;;  %v68_v21 = vld [vmem:[#allocation5 + $0xa8] sm:$0xff]  ;;  %v51_v22 = vld [vmem:[#allocation5 + $0x20] sm:$0xff] }
  0x13   :  { %106 = vmatpush.msra.mxu1 %v75_v7  ;;  %v67_v23 = vld [vmem:[#allocation5 + $0xa0] sm:$0xff]  ;;  %v50_v24 = vld [vmem:[#allocation5 + $0x18] sm:$0xff]  ;;  %v49_v26 = vld [vmem:[#allocation5 + $0x10] sm:$0xff] }
  0x14   :  { %87 = vmatpush.msra.mxu0 %v58_v8  ;;  %v66_v25 = vld [vmem:[#allocation5 + $0x98] sm:$0xff]  ;;  %v65_v27 = vld [vmem:[#allocation5 + $0x90] sm:$0xff]  ;;  %v48_v28 = vld [vmem:[#allocation5 + $0x8] sm:$0xff] }
  0x15   :  { %107 = vmatpush.msra.mxu1 %v74_v9  ;;  %v64_v29 = vld [vmem:[#allocation5 + $0x88] sm:$0xff]  ;;  %v47_v30 = vld [vmem:[#allocation5] sm:$0xff]  ;;  %v45_v32 = vld [vmem:[#allocation2] sm:$0xff] }
  0x16   :  { %88 = vmatpush.msra.mxu0 %v57_v10  ;;  %v63_v31 = vld [vmem:[#allocation5 + $0x80] sm:$0xff]  ;;  %v46_v33 = vld [vmem:[#allocation2 + $0x8] sm:$0xff]  ;;  %v147_v34 = vld [vmem:[%s265_s2] ss:$0 sm:$0xff] }
  0x17   :  { %108 = vmatpush.msra.mxu1 %v73_v11 }
  0x18   :  { %89 = vmatpush.msra.mxu0 %v56_v12 }
  0x19   :  { %109 = vmatpush.msra.mxu1 %v72_v13 }
  0x1a   :  { %90 = vmatpush.msra.mxu0 %v55_v14 }
  0x1b   :  { %110 = vmatpush.msra.mxu1 %v71_v15 }
  0x1c   :  { %91 = vmatpush.msra.mxu0 %v54_v16 }
  0x1d   :  { %111 = vmatpush.msra.mxu1 %v70_v17 }
  0x1e   :  { %92 = vmatpush.msra.mxu0 %v53_v18 }
  0x1f   :  { %112 = vmatpush.msra.mxu1 %v69_v19 }
  0x20   :  { %93 = vmatpush.msra.mxu0 %v52_v20 }
  0x21   :  { %113 = vmatpush.msra.mxu1 %v68_v21 }
  0x22   :  { %94 = vmatpush.msra.mxu0 %v51_v22 }
  0x23   :  { %114 = vmatpush.msra.mxu1 %v67_v23 }
  0x24   :  { %95 = vmatpush.msra.mxu0 %v50_v24 }
  0x25   :  { %115 = vmatpush.msra.mxu1 %v66_v25 }
  0x26   :  { %96 = vmatpush.msra.mxu0 %v49_v26 }
  0x27   :  { %116 = vmatpush.msra.mxu1 %v65_v27 }
  0x28   :  { %97 = vmatpush.msra.mxu0 %v48_v28 }
  0x29   :  { %117 = vmatpush.msra.mxu1 %v64_v29 }
  0x2a   :  { %98 = vmatpush.msra.mxu0 %v47_v30 }
  0x2b   :  { %118 = vmatpush.msra.mxu1 %v63_v31  ;;  %99 = vmatmul.f32.vlgmr.msra.gmra.mxu0 %v45_v32 }
  0x2c   :  { %119 = vmatmul.f32.vlgmr.msra.gmra.mxu1 %v46_v33 }
  0xa8   :  { %v100_v35 = vpop.f32.mrf.mxu0 }
  0xa9   :  { %v120_v36 = vpop.f32.mrf.mxu1  ;;  %v101_v37 = vadd.f32 %v147_v34, %v100_v35 }
  0xab   :  { %v121_v38 = vadd.f32 %v120_v36, %v101_v37 }
  0xad   :  { %123 = vst [vmem:[#allocation7] sm:$0xff] %v121_v38 }
  0xae   :  { %134 = dma.vmem_to_hbm [thread:$0]  %s130_s25, 128, %s132_s28, [#allocation4]  }
  0xaf   :  { %224 = dma.done.wait [#allocation4], 128  }
  0xb0   :  { %225 = vsyncadd [#allocation4], 4294967168 }
  0xb1   :  { %139 = vsyncpa [#allocation3], 1 }
  0xb2   :  { %140 = vsyncpa [#allocation6], 1 }
  0xb3   :  { %141 = vsyncpa [#allocation4], 1 }

</bundles_post_ra>
